<compile_context>
chip_gen: v7x
topology: tpu7x:2x2x1
jax: 0.10.0
libtpu: 0.0.40
codegen_flags: <defaults>
</compile_context>

<pallas_src>
import jax
import jax.numpy as jnp
from jax.experimental import pallas as pl
from jax.experimental.pallas import tpu as pltpu


def bigram_kernel(idx_ref, table_ref, out_ref):
    # idx_ref:   (TB, 1)  int32   token ids for this block
    # table_ref: (V, V)   float32 full embedding table, resident in VMEM
    # out_ref:   (TB, V)  float32 logits for this block of tokens
    tb, v = out_ref.shape
    ids = idx_ref[...]                                          # (TB, 1)
    cols = jax.lax.broadcasted_iota(jnp.int32, (tb, v), 1)      # (TB, V)
    one_hot = (ids == cols).astype(table_ref.dtype)             # (TB, V)
    # TODO(synk): if a v5e bundle dump shows the single vst slot saturating,
    # split this into 256-row sub-chunks via lax.fori_loop(..., unroll=True)
    # so the one-hot temp stays small (unlikely to bind on v6e/v7x).
    out_ref[...] = jnp.dot(
        one_hot, table_ref[...], preferred_element_type=jnp.float32
    ).astype(out_ref.dtype)


def _round_up(x, m):
    return ((x + m - 1) // m) * m


def _vmem_capacity_bytes():
    """Per-TensorCore VMEM capacity; conservative fallback if query fails."""
    try:
        return int(pltpu.get_tpu_info().vmem_capacity_bytes)
    except Exception:
        return 64 << 20  # v7x per-TC size; safe lower bound on every gen


def _vmem_need_bytes(token_block, V):
    table_bytes = V * V * 4                  # resident table, single-buffered
    out_bytes = 2 * token_block * V * 4      # double-buffered output tile
    onehot_bytes = token_block * V * 4       # materialized one-hot LHS temp
    idx_bytes = 2 * token_block * 4          # double-buffered ids tile
    scratch_bytes = 1 << 20                  # compiler internal scratch slack
    return table_bytes + out_bytes + onehot_bytes + idx_bytes + scratch_bytes


def _choose_token_block(n_rows, V, vmem_cap, target_tile_bytes=4 << 20):
    """Token block sized for a ~4 MiB lane-dense output tile (>= 1024 rows),
    capped by the problem size and shrunk only if the per-TC VMEM budget
    (table + tiles + temps) demands it."""
    tb = max(1024, target_tile_bytes // (V * 4))
    tb = max(8, (tb // 8) * 8)
    tb = min(tb, _round_up(n_rows, 8))
    while tb > 8 and _vmem_need_bytes(tb, V) > vmem_cap:
        tb = max(8, ((tb // 2) // 8) * 8)
    return tb


def bigram_forward(idx, table, *, token_block=None):
    """idx: (B, T) int, table: (V, V) float32 -> logits (B, T, V) float32."""
    B, T = idx.shape
    V = table.shape[0]
    N = B * T

    capacity = _vmem_capacity_bytes()
    # Per-TC cap: ~100 MiB on 128 MiB chips (v5e/v6e), ~51 MiB on 64 MiB v7x.
    vmem_cap = min(int(capacity * 0.8), 100 << 20)

    if token_block is None:
        token_block = _choose_token_block(N, V, vmem_cap)

    # Pad N UP to a multiple of token_block (never shrink the tile to fit N);
    # padded rows are sliced off only when padding actually happened.
    N_pad = _round_up(N, token_block)
    idx_flat = idx.reshape(N).astype(jnp.int32)
    if N_pad != N:
        idx_flat = jnp.pad(idx_flat, (0, N_pad - N))
    idx_flat = idx_flat.reshape(N_pad, 1)

    need = _vmem_need_bytes(token_block, V)
    vmem_limit = max(int(1.3 * need), min(32 << 20, vmem_cap))
    vmem_limit = min(vmem_limit, vmem_cap)

    cost = pl.CostEstimate(
        flops=2 * N_pad * V * V,
        transcendentals=0,
        bytes_accessed=N_pad * V * 4 + V * V * 4 + N_pad * 4,
    )

    logits_flat = pl.pallas_call(
        bigram_kernel,
        out_shape=jax.ShapeDtypeStruct((N_pad, V), jnp.float32),
        grid_spec=pltpu.PrefetchScalarGridSpec(
            num_scalar_prefetch=0,
            grid=(N_pad // token_block,),
            in_specs=[
                # token ids for this block
                pl.BlockSpec((token_block, 1), lambda i: (i, 0)),
                # full table, constant index_map -> resident; single-buffered
                pl.BlockSpec((V, V), lambda i: (0, 0),
                             pipeline_mode=pl.Buffered(1)),
            ],
            out_specs=pl.BlockSpec((token_block, V), lambda i: (i, 0)),
        ),
        compiler_params=pltpu.CompilerParams(
            dimension_semantics=("parallel",),
            vmem_limit_bytes=vmem_limit,
        ),
        cost_estimate=cost,
    )(idx_flat, table)

    if N_pad != N:
        logits_flat = logits_flat[:N]
    return logits_flat.reshape(B, T, V)


if __name__ == "__main__":
    # Small, deterministic setup: vocab=128 (lane-aligned), batch=2, seq=8.
    vocab_size = 128
    B, T = 2, 8

    key = jax.random.PRNGKey(0)
    k_table, k_idx = jax.random.split(key)

    # nn.Embedding default init is N(0, 1).
    table = jax.random.normal(k_table, (vocab_size, vocab_size), dtype=jnp.float32)
    idx = jax.random.randint(k_idx, (B, T), 0, vocab_size, dtype=jnp.int32)

    logits = bigram_forward(idx, table)
    logits = jax.block_until_ready(logits)

    # Reference: plain embedding gather.
    ref = jnp.take(table, idx, axis=0)
    assert logits.shape == (B, T, vocab_size)
    assert jnp.allclose(logits, ref, atol=1e-6, rtol=1e-6), "mismatch vs reference"

    print("KERNEL_OK")
</pallas_src>

<mosaic_0001>
module attributes {stable_mosaic.version = 11 : i64} {
  func.func @bigram_kernel(%arg0: i32, %arg1: memref<16x1xi32, #tpu.memory_space<vmem>>, %arg2: memref<128x128xf32, #tpu.memory_space<vmem>>, %arg3: memref<16x128xf32, #tpu.memory_space<vmem>>) attributes {dimension_semantics = [#tpu.dimension_semantics<parallel>], iteration_bounds = array<i64: 1>, scalar_prefetch = 0 : i64, scratch_operands = 0 : i64, tpu.core_type = #tpu.core_type<tc>, window_params = [{transform_indices = @transform_0, window_bounds = array<i64: 16, 1>}, {pipeline_mode = #tpu.pipeline_mode<synchronous>, transform_indices = @transform_1, window_bounds = array<i64: 128, 128>}, {transform_indices = @transform_2, window_bounds = array<i64: 16, 128>}]} {
    %c0 = arith.constant 0 : index
    %c0_0 = arith.constant 0 : index
    %0 = vector.load %arg1[%c0, %c0_0] : memref<16x1xi32, #tpu.memory_space<vmem>>, vector<16x1xi32>
    %1 = tpu.iota {dimensions = array<i32: 1>} : vector<16x128xi32>
    %2 = vector.broadcast %0 : vector<16x1xi32> to vector<16x128xi32>
    %3 = arith.cmpi eq, %2, %1 : vector<16x128xi32>
    %4 = arith.extui %3 : vector<16x128xi1> to vector<16x128xi32>
    %5 = arith.sitofp %4 : vector<16x128xi32> to vector<16x128xf32>
    %c0_1 = arith.constant 0 : index
    %c0_2 = arith.constant 0 : index
    %6 = vector.load %arg2[%c0_1, %c0_2] : memref<128x128xf32, #tpu.memory_space<vmem>>, vector<128x128xf32>
    %cst = arith.constant dense<0.000000e+00> : vector<16x128xf32>
    %7 = tpu.matmul %5, %6, %cst {dimension_numbers = #tpu.dot_dimension_numbers<[1], [0], [0], [1], [0, 0, 1, 1], [], []>} : vector<16x128xf32>, vector<128x128xf32>, vector<16x128xf32> -> vector<16x128xf32>
    %c0_3 = arith.constant 0 : index
    %c0_4 = arith.constant 0 : index
    %8 = vector.load %arg3[%c0_3, %c0_4] : memref<16x128xf32, #tpu.memory_space<vmem>>, vector<16x128xf32>
    tpu.vector_store %arg3[%c0_3, %c0_4], %7 {strides = array<i32>} : memref<16x128xf32, #tpu.memory_space<vmem>>, vector<16x128xf32>,
    return
  }
  func.func @transform_0(%arg0: i32) -> (i32, i32) {
    %c0_i32 = arith.constant 0 : i32
    %c0_i32_0 = arith.constant 0 : i32
    return %arg0, %c0_i32 : i32, i32
  }
  func.func @transform_1(%arg0: i32) -> (i32, i32) {
    %c0_i32 = arith.constant 0 : i32
    %c0_i32_0 = arith.constant 0 : i32
    %c0_i32_1 = arith.constant 0 : i32
    return %c0_i32, %c0_i32_0 : i32, i32
  }
  func.func @transform_2(%arg0: i32) -> (i32, i32) {
    %c0_i32 = arith.constant 0 : i32
    %c0_i32_0 = arith.constant 0 : i32
    return %arg0, %c0_i32 : i32, i32
  }
}

</mosaic_0001>

<bundles_post_ra>
// kernel: tpu_custom_call.1
= control target key start
LH: loop header
LB: loop body
LE: loop exit
PB: predicated region body
PF: predicated region fallthrough
CT: control target
= control target key end

     0   :  { %7 = vsyncpa [#allocation3], 0  ;;  %s353_s0 = inlined_call_operand.vmem [shape: s32[16,1], index: 0, kind: input, shape index: {}]   ;;  %s354_s1 = inlined_call_operand.hbm [shape: f32[128,128], index: 1, kind: input, shape index: {}]   ;;  %s355_s2 = inlined_call_operand.hbm [shape: f32[16,128], index: 2, kind: output, shape index: {}]  }
   0x1   :  { %8 = vsyncpa [#allocation4], 0  ;;  %s296_s9 = smov [#allocation2]   ;;  %s248_s13 = scalar_lea.hbm %s354_s1, 2048 }
   0x2   :  { %s16_s10 = sshll.u32 %s296_s9, 4  ;;  %p249_p0 = scmp.ne.s32.totalorder %s354_s1, %s248_s13  ;;  %s17_s10 = int_to_ptr.vmem [resolvable:$true] %s16_s10 }
   0x3   :  { %p252_p1 = scmp.lt.u32.totalorder %s248_s13, %s354_s1 }
   0x5   :  { %p254_p2 = pnand %p252_p1, %p249_p0 }
   0x7   :  { %257 = shalt.err (!%p254_p2)
}
   0x8   :  { %s258_s18 = scalar_lea.vmem %s17_s10, 2048  ;;  %p263_p4 = scmp.lt.s32.totalorder %s17_s10, %s17_s10 }
   0x9   :  { %p259_p3 = scmp.ne.s32.totalorder %s17_s10, %s258_s18  ;;  %p264_p5 = scmp.lt.s32.totalorder %s258_s18, %s258_s18 }
   0xb   :  { %p265_p6 = por %p264_p5, %p263_p4 }
   0xd   :  { %p266_p7 = pnand %p265_p6, %p259_p3 }
   0xf   :  { %269 = shalt.err (!%p266_p7)
}
  0x10   :  { %s297_s19 = smov 128   ;;  %s298_s20 = smov 8  }
  0x11   :  { %22 = dma.hbm_to_vmem [thread:$0]  %s354_s1, 2048, %s17_s10, [#allocation3], %s297_s19, %s297_s19, %s298_s20  }
  0x12   :  { %292 = dma.done.wait [#allocation3], 2048  }
  0x13   :  { %293 = vsyncadd [#allocation3], 4294965248  ;;  %v299_v0 = vmov 0   ;;  %v26_v1 = vld [vmem:[%s353_s0] sm:$0xff]  ;;  %v43_v3 = vld [vmem:[#allocation2 + $0x8] sm:$0xff]  ;;  %v28_v27 = vlaneseq  ;;  %v300_v30 = vmov 1.0  }
  0x14   :  { %247 = vset.pattern.permute.xlu0 %v299_v0  ;;  %v42_v2 = vld [vmem:[#allocation2] sm:$0xff]  ;;  %v44_v4 = vld [vmem:[#allocation2 + $0x10] sm:$0xff]  ;;  %v45_v5 = vld [vmem:[#allocation2 + $0x18] sm:$0xff] }
  0x15   :  { %31 = vperm.xlu0 %247, %v26_v1   ;;  %v27_v6 = vld [vmem:[%s353_s0 + $0x8] sm:$0xff]  ;;  %v209_v7 = vpack.c.bf16 %v43_v3, %v42_v2  ;;  %v213_v8 = vpack.c.bf16 %v45_v5, %v44_v4  ;;  %v46_v9 = vld [vmem:[#allocation2 + $0x20] sm:$0xff]  ;;  %v48_v12 = vld [vmem:[#allocation2 + $0x30] sm:$0xff]  ;;  %v29_v28 = vand.u32 127, %v28_v27  ;;  %s301_s0 = smov [#allocation5]  }
  0x16   :  { %v47_v10 = vld [vmem:[#allocation2 + $0x28] sm:$0xff]  ;;  %v49_v13 = vld [vmem:[#allocation2 + $0x38] sm:$0xff]  ;;  %v50_v15 = vld [vmem:[#allocation2 + $0x40] sm:$0xff]  ;;  %s140_s1 = sshll.u32 %s301_s0, 4  ;;  %s141_s1 = int_to_ptr.vmem [resolvable:$true] %s140_s1 }
  0x17   :  { %210 = vmatprep.subr.bf16.mxu0 %v209_v7  ;;  %v217_v11 = vpack.c.bf16 %v47_v10, %v46_v9  ;;  %v221_v14 = vpack.c.bf16 %v49_v13, %v48_v12  ;;  %v51_v16 = vld [vmem:[#allocation2 + $0x48] sm:$0xff]  ;;  %v52_v18 = vld [vmem:[#allocation2 + $0x50] sm:$0xff]  ;;  %v53_v19 = vld [vmem:[#allocation2 + $0x58] sm:$0xff]  ;;  %s270_s27 = scalar_lea.vmem %s141_s1, 256  ;;  %p275_p9 = scmp.lt.s32.totalorder %s141_s1, %s141_s1 }
  0x18   :  { %212 = vmatpush3.bf16.msra.mxu0 %v209_v7  ;;  %v225_v17 = vpack.c.bf16 %v51_v16, %v50_v15  ;;  %v229_v20 = vpack.c.bf16 %v53_v19, %v52_v18  ;;  %v54_v21 = vld [vmem:[#allocation2 + $0x60] sm:$0xff]  ;;  %v55_v22 = vld [vmem:[#allocation2 + $0x68] sm:$0xff]  ;;  %v56_v24 = vld [vmem:[#allocation2 + $0x70] sm:$0xff]  ;;  %p271_p8 = scmp.ne.s32.totalorder %s141_s1, %s270_s27  ;;  %p276_p10 = scmp.lt.s32.totalorder %s270_s27, %s270_s27 }
  0x19   :  { %34 = vperm.xlu0 %247, %v27_v6   ;;  %214 = vmatprep.subr.bf16.mxu0 %v213_v8  ;;  %v233_v23 = vpack.c.bf16 %v55_v22, %v54_v21  ;;  %v57_v25 = vld [vmem:[#allocation2 + $0x78] sm:$0xff] }
  0x1a   :  { %v237_v26 = vpack.c.bf16 %v57_v25, %v56_v24  ;;  %p277_p11 = por %p276_p10, %p275_p9 }
  0x1c   :  { %216 = vmatpush3.bf16.msra.mxu0 %v213_v8  ;;  %p278_p12 = pnand %p277_p11, %p271_p8 }
  0x1d   :  { %218 = vmatprep.subr.bf16.mxu0 %v217_v11 }
  0x20   :  { %220 = vmatpush3.bf16.msra.mxu0 %v217_v11 }
  0x21   :  { %222 = vmatprep.subr.bf16.mxu0 %v221_v14 }
  0x24   :  { %224 = vmatpush3.bf16.msra.mxu0 %v221_v14 }
  0x25   :  { %226 = vmatprep.subr.bf16.mxu0 %v225_v17 }
  0x28   :  { %228 = vmatpush3.bf16.msra.mxu0 %v225_v17 }
  0x29   :  { %230 = vmatprep.subr.bf16.mxu0 %v229_v20 }
  0x2c   :  { %232 = vmatpush3.bf16.msra.mxu0 %v229_v20 }
  0x2d   :  { %234 = vmatprep.subr.bf16.mxu0 %v233_v23 }
  0x30   :  { %236 = vmatpush3.bf16.msra.mxu0 %v233_v23 }
  0x31   :  { %238 = vmatprep.subr.bf16.mxu0 %v237_v26 }
  0x34   :  { %240 = vmatpush3.bf16.msra.mxu0 %v237_v26 }
  0x94   :  { %v32_v29 = vpop.permute.xlu0 %31 }
  0x95   :  { %vm36_vm0 = vcmp.eq.s32.totalorder %v32_v29, %v29_v28 }
  0x96   :  { %206 = vmatprep.mubr.msk.f32.mxu0 %vm36_vm0, %v300_v30 }
  0x98   :  { %v35_v31 = vpop.permute.xlu0 %34 }
  0x99   :  { %vm37_vm1 = vcmp.eq.s32.totalorder %v35_v31, %v29_v28 }
  0x9a   :  { %207 = vmatmul.mubr.msk.f32.vlgmr.msra.gmra.mrb[0].mxu0 %vm37_vm1, %v300_v30 }
 0x16d   :  { %v208_v32 = vpop.f32.mrb[0].mxu0 }
 0x16e   :  { %134 = vst [vmem:[#allocation5 + $0x8] sm:$0xff] %v208_v32  ;;  %v124_v33 = vpop.f32.mrb[1].mxu0 }
 0x16f   :  { %133 = vst [vmem:[#allocation5] sm:$0xff] %v124_v33 }
 0x170   :  { %281 = shalt.err (!%p278_p12)
}
 0x171   :  { %s282_s30 = scalar_lea.hbm %s355_s2, 256 }
 0x172   :  { %p283_p13 = scmp.ne.s32.totalorder %s355_s2, %s282_s30  ;;  %p286_p0 = scmp.lt.u32.totalorder %s282_s30, %s355_s2 }
 0x174   :  { %p288_p1 = pnand %p286_p0, %p283_p13 }
 0x176   :  { %291 = shalt.err (!%p288_p1)
}
 0x177   :  { %146 = dma.vmem_to_hbm [thread:$0]  %s141_s1, 256, %s355_s2, [#allocation4], %s297_s19, %s297_s19, %s298_s20  }
 0x178   :  { %294 = dma.done.wait [#allocation4], 256  }
 0x179   :  { %295 = vsyncadd [#allocation4], 4294967040 }
 0x17a   :  { %150 = vsyncpa [#allocation3], 1 }
 0x17b   :  { %151 = vsyncpa [#allocation4], 1 }

</bundles_post_ra>
